<compile_context>
chip_gen: v5e
topology: v5e:2x2
jax: 0.10.0
libtpu: 0.0.40
codegen_flags: <defaults>
</compile_context>

<pallas_src>
import jax
import jax.numpy as jnp
import numpy as np
from jax import lax
from jax.experimental import pallas as pl
from jax.experimental.pallas import tpu as pltpu


# ----------------------------------------------------------------------------
# helpers
# ----------------------------------------------------------------------------
def _round_up(x, m):
    return pl.cdiv(x, m) * m


def _ipow(x, p):
    """x ** p, exact for integer-valued p (matches torch.pow on negative base)."""
    if float(p).is_integer():
        return x ** int(p)
    return jnp.power(x, p)


def _vmem_limit_bytes():
    """Scoped VMEM limit: ~3/4 of physical, capped at 96 MiB (48 MiB on v7x)."""
    try:
        cap = pltpu.get_tpu_info().vmem_capacity_bytes
    except Exception:
        cap = 64 * 1024 * 1024          # conservative fallback (v7x-sized)
    return int(min(cap * 3 // 4, 96 * 1024 * 1024))


def _default_compute_dtype():
    """bf16 EUP/VPU exists on v6e / v7x; keep f32 on v5e and earlier."""
    try:
        kind = jax.devices()[0].device_kind.lower()
    except Exception:
        return jnp.float32
    if any(v in kind for v in ("v2", "v3", "v4", "v5")):
        return jnp.float32
    return jnp.bfloat16


def _pick_spatial_tile(hw_pad, t_cap):
    """Largest multiple of 128 that divides hw_pad and is <= t_cap."""
    n = hw_pad // 128
    cap = max(1, t_cap // 128)
    best = 1
    for d in range(1, n + 1):
        if d <= cap and n % d == 0:
            best = d
    return best * 128


# ----------------------------------------------------------------------------
# Pure-JAX reference of apply_strengths (mirrors the PyTorch code; used for
# the autograd step of the PGD loop and for correctness checking).
# ----------------------------------------------------------------------------
def apply_strengths_ref(inputs, centers, variables, colours_bcp,
                        distance_scaling, image_threshold, distance_normaliser):
    B, C, H, W = inputs.shape
    xx, yy = jnp.meshgrid(jnp.arange(H, dtype=jnp.float32),
                          jnp.arange(W, dtype=jnp.float32), indexing="xy")
    xx, yy = xx / W, yy / H
    c = centers[None, None]                                        # (1,1,P,2)
    base = 1.0 - jnp.sqrt((xx[..., None] - c[..., 0]) ** 2 +
                          (yy[..., None] - c[..., 1]) ** 2)        # (W,H,P)
    dist = _ipow(base, distance_normaliser)
    ds = dist[None] * variables[:, None, None, :]                  # (B,W,H,P)
    ds = jnp.concatenate(
        [jnp.ones_like(ds[..., :1]) * image_threshold, ds], axis=-1) * distance_scaling
    sm = jax.nn.softmax(ds, axis=-1)                               # (B,W,H,P+1)
    P = centers.shape[0]
    colour_images = jnp.broadcast_to(colours_bcp[:, :, None, None, :],
                                     (B, C, H, W, P))
    interp = jnp.concatenate([inputs[..., None], colour_images], axis=-1)
    return jnp.sum(interp * sm[:, None], axis=-1)                  # (B,C,H,W)


# ----------------------------------------------------------------------------
# Batch-invariant scaled distance field, flattened & lane-padded: (P, HW_pad).
# Computed once per call so sqrt/pow EUP work is not repeated per batch item.
# ----------------------------------------------------------------------------
def polkadot_distance_field(centers, H, W, HW_pad,
                            distance_scaling, distance_normaliser):
    HW = H * W
    k = jnp.arange(HW_pad, dtype=jnp.int32)
    x = (k % W).astype(jnp.float32) / W                 # column / width
    y = (k // W).astype(jnp.float32) / H                # row / height
    cx = centers[:, 0:1].astype(jnp.float32)            # (P, 1)
    cy = centers[:, 1:2].astype(jnp.float32)
    base = 1.0 - jnp.sqrt((x[None, :] - cx) ** 2 + (y[None, :] - cy) ** 2)
    dist = _ipow(base, distance_normaliser) * distance_scaling     # (P, HW_pad)
    return jnp.where((k < HW)[None, :], dist, 0.0)


# ----------------------------------------------------------------------------
# Pallas kernel for apply_strengths
# ----------------------------------------------------------------------------
def apply_strengths_pallas(inputs, centers, variables, colours_bcp,
                           distance_scaling, image_threshold,
                           distance_normaliser, *,
                           spatial_tile=None, use_mxu=None, compute_dtype=None):
    """inputs (B,C,H,W); centers (P,2); variables (B,P); colours_bcp (B,C,P)."""
    B, C, H, W = inputs.shape
    P = centers.shape[0]
    HW = H * W
    HW_pad = _round_up(HW, 128)        # lane alignment only (usually == HW)

    in_dtype = inputs.dtype
    out_dtype = in_dtype               # output dtype follows input dtype
    if use_mxu is None:
        use_mxu = P >= 8
    if compute_dtype is None:
        # bf16 exps only pay off when the (P,T) EUP work is significant and
        # feeds the MXU operand directly; keep f32 for the small-P VPU path.
        compute_dtype = _default_compute_dtype() if use_mxu else jnp.float32
    compute_dtype = jnp.dtype(compute_dtype)

    in_b = jnp.dtype(in_dtype).itemsize
    out_b = jnp.dtype(out_dtype).itemsize
    e_b = compute_dtype.itemsize

    vmem_limit = _vmem_limit_bytes()
    # Per-lane VMEM cost of one grid step: double-buffered x / out / dist
    # blocks plus the in-kernel (P,T)/(C+1,T) temporaries.
    per_lane = (2 * C * (in_b + out_b) + 2 * P * 4
                + P * (4 + e_b) + (C + 1) * 4 + 8 * 4)
    budget = int(vmem_limit * 0.8)
    if spatial_tile is None:
        t_cap = min(max(128, budget // per_lane), 32 * 1024, HW_pad)
    else:
        t_cap = min(max(128, _round_up(int(spatial_tile), 128)), HW_pad)
    if B == 1 and HW_pad >= 256:
        t_cap = min(t_cap, HW_pad // 2)   # keep >= 2 parallel steps (v7x: 2 TCs)
    T = _pick_spatial_tile(HW_pad, t_cap)
    n_tiles = HW_pad // T

    thresh_score = float(image_threshold) * float(distance_scaling)

    dist = polkadot_distance_field(centers, H, W, HW_pad,
                                   distance_scaling, distance_normaliser)
    vars3 = variables.astype(jnp.float32).reshape(B, P, 1)          # (B, P, 1)
    # Colours augmented with an all-ones row: the matmul / tree then yields the
    # colour interpolation AND the softmax denominator with f32 accumulation.
    cols_aug = jnp.concatenate(
        [colours_bcp.astype(jnp.float32), jnp.ones((B, 1, P), jnp.float32)],
        axis=1)                                                     # (B, C+1, P)

    x_flat = inputs.reshape(B, C, HW)          # free contiguous reshape
    if HW_pad != HW:                           # rare: only if HW % 128 != 0
        x_flat = jnp.pad(x_flat, ((0, 0), (0, 0), (0, HW_pad - HW)))

    f32 = jnp.dtype(jnp.float32)

    def kernel(vars_ref, cols_ref, dist_ref, x_ref, o_ref):
        b = pl.program_id(1)
        v = vars_ref[b]                                  # (P, 1)   strengths
        cmat = cols_ref[b]                               # (C+1, P) last row = 1
        scores = dist_ref[...] * v                       # (P, T)   f32, VPU
        m = jnp.maximum(jnp.max(scores, axis=0, keepdims=True), thresh_score)
        arg = scores - m
        if compute_dtype != f32:
            arg = arg.astype(compute_dtype)              # bf16 EUP on v6e/v7x
        e = jnp.exp(arg)                                 # (P, T)
        e0 = jnp.exp(thresh_score - m)                   # (1, T)   f32

        if use_mxu:
            # (C+1,P) x (P,T): colour interpolation + denominator in a single
            # MXU pass with f32 accumulation (no Precision.HIGHEST).
            prod = jnp.dot(cmat.astype(e.dtype), e,
                           preferred_element_type=jnp.float32)
        else:
            ef = e.astype(jnp.float32)
            parts = [cmat[:, p:p + 1] * ef[p:p + 1, :] for p in range(P)]
            while len(parts) > 1:                        # pairwise tree
                nxt = [parts[i] + parts[i + 1]
                       for i in range(0, len(parts) - 1, 2)]
                if len(parts) % 2:
                    nxt.append(parts[-1])
                parts = nxt
            prod = parts[0]                              # (C+1, T) f32

        col_acc = prod[:C, :]                            # (C, T)
        denom = e0 + prod[C:C + 1, :]                    # (1, T)
        inv = pl.reciprocal(denom, approx=True)          # EUP
        x = x_ref[0].astype(jnp.float32)                 # cast after DMA
        o_ref[0] = ((x * e0 + col_acc) * inv).astype(o_ref.dtype)

    out = pl.pallas_call(
        kernel,
        out_shape=jax.ShapeDtypeStruct((B, C, HW_pad), out_dtype),
        grid=(n_tiles, B),                 # batch innermost -> dist tile reused
        in_specs=[
            pl.BlockSpec((B, P, 1), lambda t, b: (0, 0, 0)),      # resident
            pl.BlockSpec((B, C + 1, P), lambda t, b: (0, 0, 0)),  # resident
            pl.BlockSpec((P, T), lambda t, b: (0, t)),            # dist tile
            pl.BlockSpec((1, C, T), lambda t, b: (b, 0, t)),      # pixels
        ],
        out_specs=pl.BlockSpec((1, C, T), lambda t, b: (b, 0, t)),
        compiler_params=pltpu.CompilerParams(
            dimension_semantics=("parallel", "parallel"),
            vmem_limit_bytes=vmem_limit,
        ),
    )(vars3, cols_aug, dist, x_flat)

    if HW_pad != HW:
        out = out[:, :, :HW]
    return out.reshape(B, C, H, W)


# ----------------------------------------------------------------------------
# PolkadotAdversary forward (PGD over polkadot strengths)
# ----------------------------------------------------------------------------
def polkadot_adversary_forward(model_fn, inputs, targets, *, key,
                               epsilon, num_steps, step_size, distance_metric,
                               num_polkadots, distance_scaling, image_threshold,
                               distance_normaliser):
    B, C, H, W = inputs.shape
    k_sv, k_ct, k_co = jax.random.split(key, 3)
    strength_vars = jax.random.uniform(k_sv, (B, num_polkadots), jnp.float32)
    centers = jax.random.uniform(k_ct, (num_polkadots, 2), jnp.float32)
    colours = jax.random.uniform(k_co, (B, C, num_polkadots), jnp.float32)

    if distance_metric == "linf":
        normalise = jnp.sign
        project = lambda x, eps: jnp.abs(jnp.clip(x, -eps, eps))
    elif distance_metric == "l2":
        normalise = lambda x: x / (jnp.sqrt(jnp.sum(x ** 2, axis=-1, keepdims=True)) + 1e-12)
        project = lambda x, eps: jnp.abs(
            x * jnp.minimum(1.0, eps / (jnp.sqrt(jnp.sum(x ** 2, axis=-1, keepdims=True)) + 1e-12)))
    else:
        raise ValueError(distance_metric)

    def loss_fn(sv):
        # TODO(synk): autograd through an arbitrary classifier `model` has no
        # Pallas equivalent; the gradient step uses the pure-JAX apply_strengths.
        adv = apply_strengths_ref(inputs, centers, sv, colours,
                                  distance_scaling, image_threshold,
                                  distance_normaliser)
        logits = model_fn(adv)
        logp = jax.nn.log_softmax(logits, axis=-1)
        return -jnp.mean(logp[jnp.arange(B), targets])

    grad_fn = jax.grad(loss_fn)
    for _ in range(num_steps):
        g = normalise(grad_fn(strength_vars))
        strength_vars = project(strength_vars + step_size * g, epsilon)

    # Final adversarial images via the Pallas kernel (the hot path).
    adv = apply_strengths_pallas(inputs, centers, strength_vars, colours,
                                 distance_scaling, image_threshold,
                                 distance_normaliser)
    return adv, (centers, strength_vars, colours)


# ----------------------------------------------------------------------------
if __name__ == "__main__":
    # ---- config 1: small square image, P < 8 -> f32 VPU tree path.
    B, C, H, W = 2, 4, 16, 16
    P = 3
    NUM_CLASSES = 10

    key = jax.random.PRNGKey(0)
    k_in, k_tg, k_wm, k_bm, k_adv = jax.random.split(key, 5)

    inputs = jax.random.uniform(k_in, (B, C, H, W), jnp.float32)
    targets = jax.random.randint(k_tg, (B,), 0, NUM_CLASSES)

    Wm = jax.random.normal(k_wm, (C * H * W, NUM_CLASSES), jnp.float32) * 0.01
    bm = jax.random.normal(k_bm, (NUM_CLASSES,), jnp.float32) * 0.01
    model_fn = lambda x: x.reshape(x.shape[0], -1) @ Wm + bm

    adv, (centers, strength_vars, colours) = polkadot_adversary_forward(
        model_fn, inputs, targets, key=k_adv,
        epsilon=0.5, num_steps=2, step_size=0.1, distance_metric="linf",
        num_polkadots=P, distance_scaling=10.0, image_threshold=0.3,
        distance_normaliser=2.0,
    )
    adv = jax.block_until_ready(adv)
    assert adv.shape == (B, C, H, W)

    ref = apply_strengths_ref(inputs, centers, strength_vars, colours,
                              10.0, 0.3, 2.0)
    np.testing.assert_allclose(np.asarray(adv), np.asarray(ref),
                               rtol=2e-3, atol=2e-3)

    # ---- config 2: many polkadots, bigger image; MXU interpolation path,
    #      multi-tile spatial grid, bf16 exps on bf16-capable chips.
    B2, C2, H2, W2, P2 = 2, 3, 48, 48, 32
    k1, k2, k3, k4 = jax.random.split(jax.random.PRNGKey(1), 4)
    inputs2 = jax.random.uniform(k1, (B2, C2, H2, W2), jnp.float32)
    centers2 = jax.random.uniform(k2, (P2, 2), jnp.float32)
    vars2 = jax.random.uniform(k3, (B2, P2), jnp.float32)
    colours2 = jax.random.uniform(k4, (B2, C2, P2), jnp.float32)

    out2 = apply_strengths_pallas(inputs2, centers2, vars2, colours2,
                                  8.0, 0.3, 3.0, spatial_tile=768)
    out2 = jax.block_until_ready(out2)
    ref2 = apply_strengths_ref(inputs2, centers2, vars2, colours2, 8.0, 0.3, 3.0)
    np.testing.assert_allclose(np.asarray(out2), np.asarray(ref2),
                               rtol=1e-2, atol=1e-2)

    # ---- config 3: HW not a multiple of 128 -> exercises the (rare) lane-pad
    #      path and the B == 1 grid.
    B3, C3, H3, W3, P3 = 1, 3, 10, 10, 4
    k5, k6, k7, k8 = jax.random.split(jax.random.PRNGKey(2), 4)
    inputs3 = jax.random.uniform(k5, (B3, C3, H3, W3), jnp.float32)
    centers3 = jax.random.uniform(k6, (P3, 2), jnp.float32)
    vars3 = jax.random.uniform(k7, (B3, P3), jnp.float32)
    colours3 = jax.random.uniform(k8, (B3, C3, P3), jnp.float32)

    out3 = apply_strengths_pallas(inputs3, centers3, vars3, colours3,
                                  6.0, 0.4, 2.0)
    out3 = jax.block_until_ready(out3)
    ref3 = apply_strengths_ref(inputs3, centers3, vars3, colours3, 6.0, 0.4, 2.0)
    np.testing.assert_allclose(np.asarray(out3), np.asarray(ref3),
                               rtol=2e-3, atol=2e-3)

    print("KERNEL_OK")
</pallas_src>

<mosaic_0001>
module attributes {stable_mosaic.version = 11 : i64} {
  func.func @kernel(%arg0: i32, %arg1: i32, %arg2: memref<2x3x1xf32, #tpu.memory_space<vmem>>, %arg3: memref<2x5x3xf32, #tpu.memory_space<vmem>>, %arg4: memref<3x256xf32, #tpu.memory_space<vmem>>, %arg5: memref<1x4x256xf32, #tpu.memory_space<vmem>>, %arg6: memref<1x4x256xf32, #tpu.memory_space<vmem>>) attributes {dimension_semantics = [#tpu.dimension_semantics<parallel>, #tpu.dimension_semantics<parallel>], iteration_bounds = array<i64: 1, 2>, scalar_prefetch = 0 : i64, scratch_operands = 0 : i64, tpu.core_type = #tpu.core_type<tc>, window_params = [{pipeline_mode = #tpu.pipeline_mode<synchronous>, transform_indices = @transform_0, window_bounds = array<i64: 2, 3, 1>}, {pipeline_mode = #tpu.pipeline_mode<synchronous>, transform_indices = @transform_1, window_bounds = array<i64: 2, 5, 3>}, {transform_indices = @transform_2, window_bounds = array<i64: 3, 256>}, {transform_indices = @transform_3, window_bounds = array<i64: 1, 4, 256>}, {transform_indices = @transform_4, window_bounds = array<i64: 1, 4, 256>}]} {
    %0 = arith.index_cast %arg1 : i32 to index
    %c0 = arith.constant 0 : index
    %c0_0 = arith.constant 0 : index
    %1 = vector.load %arg2[%0, %c0, %c0_0] : memref<2x3x1xf32, #tpu.memory_space<vmem>>, vector<1x3x1xf32>
    %2 = vector.shape_cast %1 : vector<1x3x1xf32> to vector<3x1xf32>
    %3 = arith.index_cast %arg1 : i32 to index
    %c0_1 = arith.constant 0 : index
    %c0_2 = arith.constant 0 : index
    %4 = vector.load %arg3[%3, %c0_1, %c0_2] : memref<2x5x3xf32, #tpu.memory_space<vmem>>, vector<1x5x3xf32>
    %5 = vector.shape_cast %4 : vector<1x5x3xf32> to vector<5x3xf32>
    %c0_3 = arith.constant 0 : index
    %c0_4 = arith.constant 0 : index
    %6 = vector.load %arg4[%c0_3, %c0_4] : memref<3x256xf32, #tpu.memory_space<vmem>>, vector<3x256xf32>
    %7 = vector.broadcast %2 : vector<3x1xf32> to vector<3x256xf32>
    %8 = arith.mulf %6, %7 : vector<3x256xf32>
    %cst = arith.constant dense<0xFF800000> : vector<256xf32>
    %9 = vector.multi_reduction <maximumf>, %8, %cst [0] : vector<3x256xf32> to vector<256xf32>
    %10 = vector.shape_cast %9 : vector<256xf32> to vector<1x256xf32>
    %cst_5 = arith.constant 3.000000e+00 : f32
    %11 = vector.broadcast %cst_5 : f32 to vector<1x256xf32>
    %12 = arith.maximumf %10, %11 : vector<1x256xf32>
    %13 = vector.broadcast %12 : vector<1x256xf32> to vector<3x256xf32>
    %14 = arith.subf %8, %13 : vector<3x256xf32>
    %15 = math.exp %14 : vector<3x256xf32>
    %cst_6 = arith.constant 3.000000e+00 : f32
    %16 = vector.broadcast %cst_6 : f32 to vector<1x256xf32>
    %17 = arith.subf %16, %12 : vector<1x256xf32>
    %18 = math.exp %17 : vector<1x256xf32>
    %19 = vector.extract_strided_slice %5 {offsets = [0, 0], sizes = [5, 1], strides = [1, 1]} : vector<5x3xf32> to vector<5x1xf32>
    %20 = vector.extract_strided_slice %15 {offsets = [0, 0], sizes = [1, 256], strides = [1, 1]} : vector<3x256xf32> to vector<1x256xf32>
    %21 = vector.broadcast %19 : vector<5x1xf32> to vector<5x256xf32>
    %22 = vector.broadcast %20 : vector<1x256xf32> to vector<5x256xf32>
    %23 = arith.mulf %21, %22 : vector<5x256xf32>
    %24 = vector.extract_strided_slice %5 {offsets = [0, 1], sizes = [5, 1], strides = [1, 1]} : vector<5x3xf32> to vector<5x1xf32>
    %25 = vector.extract_strided_slice %15 {offsets = [1, 0], sizes = [1, 256], strides = [1, 1]} : vector<3x256xf32> to vector<1x256xf32>
    %26 = vector.broadcast %24 : vector<5x1xf32> to vector<5x256xf32>
    %27 = vector.broadcast %25 : vector<1x256xf32> to vector<5x256xf32>
    %28 = arith.mulf %26, %27 : vector<5x256xf32>
    %29 = vector.extract_strided_slice %5 {offsets = [0, 2], sizes = [5, 1], strides = [1, 1]} : vector<5x3xf32> to vector<5x1xf32>
    %30 = vector.extract_strided_slice %15 {offsets = [2, 0], sizes = [1, 256], strides = [1, 1]} : vector<3x256xf32> to vector<1x256xf32>
    %31 = vector.broadcast %29 : vector<5x1xf32> to vector<5x256xf32>
    %32 = vector.broadcast %30 : vector<1x256xf32> to vector<5x256xf32>
    %33 = arith.mulf %31, %32 : vector<5x256xf32>
    %34 = arith.addf %23, %28 : vector<5x256xf32>
    %35 = arith.addf %34, %33 : vector<5x256xf32>
    %36 = vector.extract_strided_slice %35 {offsets = [0, 0], sizes = [4, 256], strides = [1, 1]} : vector<5x256xf32> to vector<4x256xf32>
    %37 = vector.extract_strided_slice %35 {offsets = [4, 0], sizes = [1, 256], strides = [1, 1]} : vector<5x256xf32> to vector<1x256xf32>
    %38 = arith.addf %18, %37 : vector<1x256xf32>
    %39 = tpu.reciprocal %38 {approx = true} : vector<1x256xf32> -> vector<1x256xf32>
    %c0_7 = arith.constant 0 : index
    %c0_8 = arith.constant 0 : index
    %c0_9 = arith.constant 0 : index
    %40 = vector.load %arg5[%c0_7, %c0_8, %c0_9] : memref<1x4x256xf32, #tpu.memory_space<vmem>>, vector<1x4x256xf32>
    %41 = vector.shape_cast %40 : vector<1x4x256xf32> to vector<4x256xf32>
    %42 = vector.broadcast %18 : vector<1x256xf32> to vector<4x256xf32>
    %43 = arith.mulf %41, %42 : vector<4x256xf32>
    %44 = arith.addf %43, %36 : vector<4x256xf32>
    %45 = vector.broadcast %39 : vector<1x256xf32> to vector<4x256xf32>
    %46 = arith.mulf %44, %45 : vector<4x256xf32>
    %c0_10 = arith.constant 0 : index
    %c0_11 = arith.constant 0 : index
    %c0_12 = arith.constant 0 : index
    %47 = vector.load %arg6[%c0_10, %c0_11, %c0_12] : memref<1x4x256xf32, #tpu.memory_space<vmem>>, vector<1x4x256xf32>
    %48 = vector.shape_cast %47 : vector<1x4x256xf32> to vector<4x256xf32>
    %49 = vector.shape_cast %46 : vector<4x256xf32> to vector<1x4x256xf32>
    tpu.vector_store %arg6[%c0_10, %c0_11, %c0_12], %49 {strides = array<i32>} : memref<1x4x256xf32, #tpu.memory_space<vmem>>, vector<1x4x256xf32>,
    return
  }
  func.func @transform_0(%arg0: i32, %arg1: i32) -> (i32, i32, i32) {
    %c0_i32 = arith.constant 0 : i32
    %c0_i32_0 = arith.constant 0 : i32
    %c0_i32_1 = arith.constant 0 : i32
    %c0_i32_2 = arith.constant 0 : i32
    return %c0_i32, %c0_i32_0, %c0_i32_1 : i32, i32, i32
  }
  func.func @transform_1(%arg0: i32, %arg1: i32) -> (i32, i32, i32) {
    %c0_i32 = arith.constant 0 : i32
    %c0_i32_0 = arith.constant 0 : i32
    %c0_i32_1 = arith.constant 0 : i32
    %c0_i32_2 = arith.constant 0 : i32
    return %c0_i32, %c0_i32_0, %c0_i32_1 : i32, i32, i32
  }
  func.func @transform_2(%arg0: i32, %arg1: i32) -> (i32, i32) {
    %c0_i32 = arith.constant 0 : i32
    %c0_i32_0 = arith.constant 0 : i32
    return %c0_i32, %arg0 : i32, i32
  }
  func.func @transform_3(%arg0: i32, %arg1: i32) -> (i32, i32, i32) {
    %c0_i32 = arith.constant 0 : i32
    %c0_i32_0 = arith.constant 0 : i32
    return %arg1, %c0_i32, %arg0 : i32, i32, i32
  }
  func.func @transform_4(%arg0: i32, %arg1: i32) -> (i32, i32, i32) {
    %c0_i32 = arith.constant 0 : i32
    %c0_i32_0 = arith.constant 0 : i32
    return %arg1, %c0_i32, %arg0 : i32, i32, i32
  }
}

</mosaic_0001>

<bundles_post_ra>
// kernel: tpu_custom_call.1
= control target key start
LH: loop header
LB: loop body
LE: loop exit
PB: predicated region body
PF: predicated region fallthrough
CT: control target
= control target key end

     0   :  { %9 = vsyncpa [#allocation3], 0  ;;  %s801_s0 = inlined_call_operand.vmem [shape: f32[2,3,1], index: 0, kind: input, shape index: {}]   ;;  %s802_s1 = inlined_call_operand.vmem [shape: f32[2,5,3], index: 1, kind: input, shape index: {}]   ;;  %s803_s2 = inlined_call_operand.vmem [shape: f32[3,256], index: 2, kind: input, shape index: {}]   ;;  %s804_s3 = inlined_call_operand.vmem [shape: f32[2,4,256], index: 3, kind: input, shape index: {}]   ;;  %s805_s4 = inlined_call_operand.hbm [shape: f32[2,4,256], index: 4, kind: output, shape index: {}]  }
   0x1   :  { %11 = vsyncpa [#allocation3 + $0x1], 0  ;;  %s686_s15 = smov 0   ;;  %s688_s16 = smov 0  }
   0x2   :  { %s690_s17 = smov 0   ;;  %s692_s18 = smov 0  }
   0x3   :  { %s694_s19 = smov 0   ;;  %s696_s20 = smov 0  }
   0x4 LB: > { %s486_s21 = sadd.s32 4294967295, %s655_s20   ;;  %s487_s22 = sadd.s32 4294967294, %s655_s20   ;;  %s655_s20 = sphi %s696_s20, %s17_s20   ;;  %s651_s19 = sphi %s694_s19, %s812_s19   ;;  %s647_s18 = sphi %s692_s18, %s811_s18   ;;  %s643_s17 = sphi %s690_s17, %s810_s17   ;;  %s639_s16 = sphi %s688_s16, %s809_s16   ;;  %s635_s15 = sphi %s686_s15, %s808_s15  }
   0x5   : > { %s26_s23 = sadd.s32 1, %s651_s19  ;;  %s134_s24 = sadd.s32 1, %s643_s17 }
   0x6   : > { %p27_p0 = scmp.ge.s32.totalorder %s26_s23, 2  ;;  %p144_p1 = scmp.ne.s32.totalorder %s643_s17, %s639_s16 }
   0x7   : > { %p145_p2 = scmp.eq.s32.totalorder %s486_s21, 1  ;;  %p150_p3 = scmp.ne.s32.totalorder %s639_s16, %s635_s15 }
   0x8   : > { %s814_s23 = smov (%p27_p0, %s26_s23), 0  ;;  %p151_p5 = scmp.eq.s32.totalorder %s487_s22, 1 }
   0x9   : > { %p726_p4 = por %p145_p2, %p144_p1  ;;  %s129_s26 = ssub.s32 %s651_s19, %s814_s23 }
   0xa   : > { %p491_p6 = scmp.ge.s32.totalorder %s655_s20, 1  ;;  %p132_p7 = scmp.eq.s32.totalorder %s129_s26, 0 }
   0xb   : > { %p733_p8 = por %p151_p5, %p150_p3  ;;  %p197_p9 = scmp.lt.s32.totalorder %s655_s20, 3 }
   0xc   : > { %s739_s28 = scalar_select %p132_p7, %s643_s17, %s134_s24  }
   0xd   : > { %p198_p10 = pnand %p491_p6, %p197_p9 }
   0xe   : > { %s495_s29 = sshll.u32 (!%p198_p10), %s647_s18, 2  ;;  %s496_s30 = sshll.u32 (!%p198_p10), %s647_s18, 3 }
   0xf   : > { %201 = sbr.rel (%p198_p10) target bundleno = 208 (0xd0), region = 36  ;;  %s250_s7 = scalar_lea.vmem (!%p198_p10), %s801_s0, %s495_s29 }
  0x10   : > { %s253_s10 = scalar_lea.vmem (!%p198_p10), %s802_s1, %s496_s30  ;;  %p239_p11 = scmp.lt.s32.totalorder (!%p198_p10), %s647_s18, 1 }
  0x11   : > { %s229_s21 = sand.u32 (!%p198_p10), 1, %s639_s16  }
  0x12   : > { %s492_s29 = sshll.u32 (!%p198_p10), %s229_s21, 3 }
  0x13   : > { %s231_s8 = scalar_lea.vmem (!%p198_p10), [#allocation2], %s492_s29 }
  0x14   : > { %v657_v0 = vmov 0   ;;  %v658_v1 = vmov 1   ;;  %v251_v2 = vld [vmem:[%s250_s7] sm:$0x7]  ;;  %v659_v4 = vmov 2   ;;  %vm272_vm0 = vcmask 1042432   ;;  %s386_s7 = scalar_lea.hbm %s805_s4, %s496_s30 }
  0x15   : > { %563 = vset.pattern.permute.xlu0 %v657_v0  ;;  %564 = vset.pattern.permute.xlu1 %v658_v1  ;;  %v254_v3 = vld [vmem:[%s253_s10] sm:$0x1f]  ;;  %v660_v5 = vmov 839922192   ;;  %vm292_vm1 = vcmask 1043456   ;;  %s240_s13 = scalar_select %p239_p11, %s647_s18, 1 }
  0x16   : > { %258 = vperm.xlu0 %563, %v251_v2   ;;  %319 = vperm.xlu1 %564, %v254_v3   ;;  %v261_v6 = vunpack.c.l.s4 %v660_v5  ;;  %v255_v8 = vld [vmem:[%s803_s2] sm:$0x77]  ;;  %s388_s9 = sshll.u32 %s231_s8, 4  ;;  %s390_s10 = sshll.u32 %s386_s7, 4  ;;  %s389_s9 = int_to_ptr.vmem [resolvable:$true] %s388_s9  ;;  %s391_s10 = int_to_ptr.hbm [resolvable:$true] %s390_s10 }
  0x17   : > { %s502_s14 = sshll.u32 %s240_s13, 3  ;;  %s373_s18 = scalar_lea.sflag [#allocation3], %s229_s21 }
  0x18   : > { %v262_v7 = vunpack.c.0.s8 %v261_v6  ;;  %s246_s26 = scalar_lea.vmem %s804_s3, %s502_s14  ;;  %s591_s11 = sshra.s32 %s391_s10, 4  ;;  %s592_s11 = int_to_ptr.hbm [resolvable:$true] %s591_s11 }
  0x19   : > { %s593_s30 = scalar_lea.hbm %s592_s11, 8  ;;  %s597_s14 = scalar_lea.hbm %s805_s4, 16 }
  0x1a   : > { %p594_p12 = scmp.ne.s32.totalorder %s592_s11, %s593_s30  ;;  %p598_p1 = scmp.lt.s32.totalorder %s592_s11, %s805_s4 }
  0x1b   : > { %p599_p2 = scmp.lt.s32.totalorder %s597_s14, %s593_s30 }
  0x1c   : > { %p595_p13 = pnand %p594_p12, %p726_p4 }
  0x1d   : > { %p600_p3 = por %p599_p2, %p598_p1 }
  0x1e   : > { %306 = vperm.xlu0 %563, %v254_v3   ;;  %565 = vset.pattern.permute.xlu1 %v659_v4  ;;  %p596_p0 = pneg %p595_p13 }
  0x1f   : > { %331 = vperm.xlu1 %565, %v254_v3  }
  0x20   : > { %p601_p5 = pnand %p600_p3, %p596_p0 }
  0x26   : > { %566 = vset.pattern.permute.xlu0 %v659_v4 }
  0x88   : > { %v259_v9 = vpop.permute.xlu0 %258  ;;  %v320_v35 = vpop.permute.xlu1 %319 }
  0x89   : > { %v263_v10 = vperm.slane %v259_v9, %v262_v7  ;;  %v350_v7 = vld [vmem:[%s246_s26] sm:$0xff] }
  0x8b   : > { %v265_v11 = vmul.f32 %v263_v10, %v255_v8 }
  0x8d   : > { %267 = vst [vmem:[#allocation1] ss:$2 sm:$0xff] %v265_v11 }
  0x90   : > { %v307_v50 = vpop.permute.xlu0 %306 }
  0x91   : > { %v332_v51 = vpop.permute.xlu1 %331 }
  0x94   : > { %v268_v12 = vld.sshfl [vmem:[#allocation1] sm:$0xff pattern:$0x75316420]  ;;  %v269_v13 = vld.sshfl [vmem:[#allocation1 + $0x8] sm:$0xff pattern:$0x75316420] }
  0x95   : > { %v273_v14 = vsel %vm272_vm0, %v268_v12, -inf  ;;  %v280_v15 = vsel %vm272_vm0, %v269_v13, -inf }
  0x96   : > { %v274_v16 = vrot.slane %v273_v14, 4  ;;  %v281_v17 = vrot.slane %v280_v15, 4 }
  0x98   : > { %v275_v18 = vmax.f32 %v273_v14, %v274_v16  ;;  %v282_v19 = vmax.f32 %v280_v15, %v281_v17 }
  0x9a   : > { %v276_v20 = vrot.slane %v275_v18, 2  ;;  %v283_v21 = vrot.slane %v282_v19, 2 }
  0x9c   : > { %v277_v22 = vmax.f32 %v275_v18, %v276_v20  ;;  %v284_v23 = vmax.f32 %v282_v19, %v283_v21 }
  0x9e   : > { %v278_v24 = vrot.slane %v277_v22, 1  ;;  %v285_v25 = vrot.slane %v284_v23, 1 }
  0xa0   : > { %v279_v26 = vmax.f32 %v277_v22, %v278_v24  ;;  %v286_v27 = vmax.f32 %v284_v23, %v285_v25 }
  0xa2   : > { %v288_v28 = vmax.f32 %v286_v27, 3.0  ;;  %v287_v29 = vmax.f32 %v279_v26, 3.0 }
  0xa4   : > { %v291_v30 = vrot.slane %v288_v28, 4  ;;  %v298_v34 = vsub.f32 3.0, %v287_v29  ;;  %v299_v36 = vsub.f32 3.0, %v288_v28 }
  0xa6   : > { %v293_v31 = vsel %vm292_vm1, %v287_v29, %v291_v30  ;;  %v300_v37 = vmul.f32 1.442695, %v298_v34  ;;  %v302_v39 = vmul.f32 1.442695, %v299_v36 }
  0xa7   : > { %v295_v32 = vsub.f32 %v265_v11, %v293_v31 }
  0xa9   : > { %v296_v33 = vmul.f32 1.442695, %v295_v32 }
  0xab   : > { %567 = vpow2.f32 %v296_v33 }
  0xac   : > { %569 = vpow2.f32 %v300_v37 }
  0xad   : > { %571 = vpow2.f32 %v302_v39 }
  0xb1   : > { %v568_v38 = vpop.eup %567 }
  0xb2   : > { %v310_v40 = vperm.slane %v568_v38, 0  ;;  %v311_v41 = vperm.slane %v568_v38, 4  ;;  %v322_v42 = vperm.slane %v568_v38, 1  ;;  %v323_v43 = vperm.slane %v568_v38, 5  ;;  %v570_v62 = vpop.eup %569 }
  0xb3   : > { %v334_v44 = vperm.slane %v568_v38, 2  ;;  %v335_v45 = vperm.slane %v568_v38, 6  ;;  %v572_v1 = vpop.eup %571 }
  0xb4   : > { %v314_v46 = vperm.slane %v310_v40, 0  ;;  %v315_v47 = vperm.slane %v311_v41, 0  ;;  %v326_v48 = vperm.slane %v322_v42, 1  ;;  %v327_v49 = vperm.slane %v323_v43, 1 }
  0xb5   : > { %v338_v52 = vperm.slane %v334_v44, 2  ;;  %v339_v53 = vperm.slane %v335_v45, 2  ;;  %v353_v4 = vrot.slane %v572_v1, 4 }
  0xb6   : > { %v316_v54 = vmul.f32 %v314_v46, %v307_v50  ;;  %v317_v55 = vmul.f32 %v315_v47, %v307_v50  ;;  %v328_v56 = vmul.f32 %v326_v48, %v320_v35  ;;  %v329_v57 = vmul.f32 %v327_v49, %v320_v35 }
  0xb7   : > { %v340_v60 = vmul.f32 %v338_v52, %v332_v51  ;;  %v341_v61 = vmul.f32 %v339_v53, %v332_v51  ;;  %v354_v8 = vsel %vm292_vm1, %v570_v62, %v353_v4 }
  0xb8   : > { %v342_v58 = vadd.f32 %v328_v56, %v316_v54  ;;  %v343_v59 = vadd.f32 %v329_v57, %v317_v55  ;;  %v356_v12 = vmul.f32 %v354_v8, %v350_v7 }
  0xba   : > { %v344_v63 = vadd.f32 %v342_v58, %v340_v60  ;;  %v345_v0 = vadd.f32 %v343_v59, %v341_v61 }
  0xbc   : > { %v346_v2 = vadd.f32 %v570_v62, %v344_v63  ;;  %v347_v3 = vadd.f32 %v572_v1, %v345_v0  ;;  %v359_v5 = vrot.slane %v345_v0, 4 }
  0xbe   : > { %573 = vrcp.f32 %v346_v2  ;;  %v360_v10 = vsel %vm292_vm1, %v344_v63, %v359_v5 }
  0xbf   : > { %575 = vrcp.f32 %v347_v3  ;;  %v362_v15 = vadd.f32 %v360_v10, %v356_v12 }
  0xc4   : > { %v574_v6 = vpop.eup %573 }
  0xc5   : > { %v576_v9 = vpop.eup %575  ;;  %v363_v13 = vperm.slane %v574_v6, 4 }
  0xc6   : > { %v364_v11 = vperm.slane %v576_v9, 4 }
  0xc8   : > { %v367_v14 = vrot.slane %v364_v11, 4 }
  0xca   : > { %v368_v16 = vsel %vm292_vm1, %v363_v13, %v367_v14 }
  0xcb   : > { %v370_v17 = vmul.f32 %v368_v16, %v362_v15 }
  0xcd   : > { %371 = vst [vmem:[%s231_s8] sm:$0xff] %v370_v17 }
  0xce   : > { %604 = shalt.err (!%p601_p5)
}
  0xcf   : > { %504 = dma.vmem_to_hbm [thread:$0]  (%p726_p4), %s389_s9, 128, %s391_s10, %s373_s18  }
  0xd0 PF: > { %p510_p6 = scmp.ge.s32.totalorder %s655_s20, 2  ;;  %s402_s21 = sand.u32 1, %s635_s15  }
  0xd1   : > { %s403_s26 = scalar_lea.sflag [#allocation3], %s402_s21 }
  0xd2   : > { %p507_p7 = pnand %p510_p6, %p733_p8 }
  0xd4   : > { %p508_p9 = pneg %p507_p7 }
  0xd6   : > { %630 = dma.done.wait (%p508_p9), %s403_s26, 128  }
  0xd7   : > { %632 = vsyncadd (%p508_p9), %s403_s26, 4294967168  ;;  %s17_s20 = sadd.s32 1, %s655_s20   ;;  %s808_s15 = smov %s639_s16 }
  0xd8   : > { %p14_p10 = scmp.ge.s32.totalorder %s17_s20, 4   ;;  %s809_s16 = smov %s643_s17 }
  0xd9   : > { %s810_s17 = smov %s739_s28  ;;  %s811_s18 = smov %s651_s19 }
  0xda   : > { %s812_s19 = smov %s814_s23  ;;  %16 = sbr.rel (!%p14_p10) target bundleno = 4 (0x4), region = 76 }
  0xdf   :  { %409 = vsyncpa [#allocation3], 1 }
  0xe0   :  { %411 = vsyncpa [#allocation3 + $0x1], 1 }

</bundles_post_ra>
